<compile_context>
chip_gen: v7x
topology: tpu7x:2x2x1
jax: 0.10.0
libtpu: 0.0.40
codegen_flags: <defaults>
</compile_context>

<pallas_src>
import math

import jax
import jax.numpy as jnp
from jax.experimental import pallas as pl
from jax.experimental.pallas import tpu as pltpu


def _round_up(n, m):
    return ((n + m - 1) // m) * m


def mlp_kernel(x_ref, w1t_ref, b1_ref, w2t_ref, b2_ref, o_ref):
    # x_ref  : (TM, latent)  batch-major tile, streamed/double-buffered over the grid
    # w1t_ref: (latent, H)   VMEM-resident (constant index_map)
    # b1_ref : (1, H)
    # w2t_ref: (H, C)
    # b2_ref : (1, C)
    # o_ref  : (TM, C)       written directly into the final (B, C) logits array
    x = x_ref[...]
    # Layer 1: Linear + ReLU (MXU matmul, f32 accumulate; epilogue on VPU)
    h = jnp.dot(x, w1t_ref[...], preferred_element_type=jnp.float32)
    h = jnp.maximum(h + b1_ref[...], 0.0)
    # Layer 2 (output head): Linear, no activation
    out = jnp.dot(h, w2t_ref[...], preferred_element_type=jnp.float32)
    o_ref[...] = (out + b2_ref[...]).astype(o_ref.dtype)


def _choose_batch_tile(B, block_batch):
    """Pick a sublane-aligned batch tile; never pad the batch itself."""
    block_batch = max(8, _round_up(block_batch, 8))  # sublane (8) alignment for multi-tile grids
    if B <= block_batch:
        if B >= 2048:
            # Big enough to split in two so v7x's second TensorCore gets work.
            return _round_up(pl.cdiv(B, 2), 8)
        return B  # single full-extent block (always layout-legal, even if B % 8 != 0)
    return block_batch


def mlp_classifier_forward(x, w1, b1, w2, b2, *, block_batch=8192):
    """Forward pass matching MLPClassifier(n_layers=2).

    x : (B, latent)  f32
    w1: (H, latent), b1: (H,)   -- PyTorch nn.Linear storage (out_features, in_features)
    w2: (C, H),      b2: (C,)
    returns (B, C) logits.
    """
    B, latent = x.shape
    H = w1.shape[0]
    C = w2.shape[0]
    assert w1.shape == (H, latent) and b1.shape == (H,)
    assert w2.shape == (C, H) and b2.shape == (C,)

    # One-off layout plumbing on the tiny parameters only (x is consumed as-is).
    w1t = jnp.transpose(w1)        # (latent, H)
    w2t = jnp.transpose(w2)        # (H, C)
    b1r = b1.reshape(1, H)
    b2r = b2.reshape(1, C)

    tm = _choose_batch_tile(B, block_batch)
    grid = (pl.cdiv(B, tm),)       # partial final tile allowed; no batch padding

    out = pl.pallas_call(
        mlp_kernel,
        out_shape=jax.ShapeDtypeStruct((B, C), x.dtype),
        grid_spec=pltpu.PrefetchScalarGridSpec(
            num_scalar_prefetch=0,
            grid=grid,
            in_specs=[
                # x streams over the batch grid; params stay resident (index_map -> (0,0)).
                pl.BlockSpec((tm, latent), lambda i: (i, 0)),
                pl.BlockSpec((latent, H), lambda i: (0, 0)),
                pl.BlockSpec((1, H), lambda i: (0, 0)),
                pl.BlockSpec((H, C), lambda i: (0, 0)),
                pl.BlockSpec((1, C), lambda i: (0, 0)),
            ],
            out_specs=pl.BlockSpec((tm, C), lambda i: (i, 0)),
        ),
        compiler_params=pltpu.CompilerParams(
            # Batch axis is fully independent -> shard across TCs (v7x).
            dimension_semantics=("parallel",),
            # ~20 MB working set at tm=8192; 48 MiB leaves headroom and is safe on
            # v5e/v6e (128 MiB) and below the practical ceiling on v7x (64 MiB).
            vmem_limit_bytes=48 * 1024 * 1024,
        ),
    )(x, w1t, b1r, w2t, b2r)
    return out


def init_params(key, latent_dim=10, hidden_size=60, n_class=17):
    """Deterministic init mirroring MLPClassifier._weight_init (n_layers=2).

    Weights kept in PyTorch (out_features, in_features) layout.
    """
    k = math.sqrt(1.0 / hidden_size)
    k1, k2 = jax.random.split(key)
    # hidden layer: uniform(-k, k) weights, zero bias
    w1 = jax.random.uniform(k1, (hidden_size, latent_dim),
                            minval=-k, maxval=k, dtype=jnp.float32)
    b1 = jnp.zeros((hidden_size,), dtype=jnp.float32)
    # output layer: uniform(-0.1, 0.1) weights, zero bias
    w2 = jax.random.uniform(k2, (n_class, hidden_size),
                            minval=-0.1, maxval=0.1, dtype=jnp.float32)
    b2 = jnp.zeros((n_class,), dtype=jnp.float32)
    return w1, b1, w2, b2


if __name__ == "__main__":
    key = jax.random.PRNGKey(0)
    k_in, k_param = jax.random.split(key)

    # Small shapes consistent with the module (latent=10, hidden=60, classes=17).
    batch, latent_dim, hidden_size, n_class = 200, 10, 60, 17
    x = jax.random.normal(k_in, (batch, latent_dim), dtype=jnp.float32)
    w1, b1, w2, b2 = init_params(k_param, latent_dim, hidden_size, n_class)

    # Reference in plain JAX (same semantics as the PyTorch forward).
    ref = jnp.maximum(x @ w1.T + b1, 0.0) @ w2.T + b2

    # 1) Default (single big tile) path.
    out1 = jax.block_until_ready(mlp_classifier_forward(x, w1, b1, w2, b2))
    assert out1.shape == (batch, n_class)
    assert jnp.allclose(out1, ref, atol=1e-5, rtol=1e-5)

    # 2) Multi-step grid with a partial final tile (exercises masked boundary block).
    out2 = jax.block_until_ready(
        mlp_classifier_forward(x, w1, b1, w2, b2, block_batch=64))
    assert out2.shape == (batch, n_class)
    assert jnp.allclose(out2, ref, atol=1e-5, rtol=1e-5)

    print("KERNEL_OK")
</pallas_src>

<mosaic_0001>
module attributes {stable_mosaic.version = 11 : i64} {
  func.func @mlp_kernel(%arg0: i32, %arg1: memref<200x10xf32, #tpu.memory_space<vmem>>, %arg2: memref<10x60xf32, #tpu.memory_space<vmem>>, %arg3: memref<1x60xf32, #tpu.memory_space<vmem>>, %arg4: memref<60x17xf32, #tpu.memory_space<vmem>>, %arg5: memref<1x17xf32, #tpu.memory_space<vmem>>, %arg6: memref<200x17xf32, #tpu.memory_space<vmem>>) attributes {dimension_semantics = [#tpu.dimension_semantics<parallel>], iteration_bounds = array<i64: 1>, scalar_prefetch = 0 : i64, scratch_operands = 0 : i64, tpu.core_type = #tpu.core_type<tc>, window_params = [{transform_indices = @transform_0, window_bounds = array<i64: 200, 10>}, {pipeline_mode = #tpu.pipeline_mode<synchronous>, transform_indices = @transform_1, window_bounds = array<i64: 10, 60>}, {pipeline_mode = #tpu.pipeline_mode<synchronous>, transform_indices = @transform_2, window_bounds = array<i64: 1, 60>}, {pipeline_mode = #tpu.pipeline_mode<synchronous>, transform_indices = @transform_3, window_bounds = array<i64: 60, 17>}, {pipeline_mode = #tpu.pipeline_mode<synchronous>, transform_indices = @transform_4, window_bounds = array<i64: 1, 17>}, {transform_indices = @transform_5, window_bounds = array<i64: 200, 17>}]} {
    %c0 = arith.constant 0 : index
    %c0_0 = arith.constant 0 : index
    %0 = vector.load %arg1[%c0, %c0_0] : memref<200x10xf32, #tpu.memory_space<vmem>>, vector<200x10xf32>
    %c0_1 = arith.constant 0 : index
    %c0_2 = arith.constant 0 : index
    %1 = vector.load %arg2[%c0_1, %c0_2] : memref<10x60xf32, #tpu.memory_space<vmem>>, vector<10x60xf32>
    %cst = arith.constant dense<0.000000e+00> : vector<200x60xf32>
    %2 = tpu.matmul %0, %1, %cst {dimension_numbers = #tpu.dot_dimension_numbers<[1], [0], [0], [1], [0, 0, 1, 1], [], []>} : vector<200x10xf32>, vector<10x60xf32>, vector<200x60xf32> -> vector<200x60xf32>
    %c0_3 = arith.constant 0 : index
    %c0_4 = arith.constant 0 : index
    %3 = vector.load %arg3[%c0_3, %c0_4] : memref<1x60xf32, #tpu.memory_space<vmem>>, vector<1x60xf32>
    %4 = vector.broadcast %3 : vector<1x60xf32> to vector<200x60xf32>
    %5 = arith.addf %2, %4 : vector<200x60xf32>
    %cst_5 = arith.constant 0.000000e+00 : f32
    %6 = vector.broadcast %cst_5 : f32 to vector<200x60xf32>
    %7 = arith.maximumf %5, %6 : vector<200x60xf32>
    %c0_6 = arith.constant 0 : index
    %c0_7 = arith.constant 0 : index
    %8 = vector.load %arg4[%c0_6, %c0_7] : memref<60x17xf32, #tpu.memory_space<vmem>>, vector<60x17xf32>
    %cst_8 = arith.constant dense<0.000000e+00> : vector<200x17xf32>
    %9 = tpu.matmul %7, %8, %cst_8 {dimension_numbers = #tpu.dot_dimension_numbers<[1], [0], [0], [1], [0, 0, 1, 1], [], []>} : vector<200x60xf32>, vector<60x17xf32>, vector<200x17xf32> -> vector<200x17xf32>
    %c0_9 = arith.constant 0 : index
    %c0_10 = arith.constant 0 : index
    %10 = vector.load %arg5[%c0_9, %c0_10] : memref<1x17xf32, #tpu.memory_space<vmem>>, vector<1x17xf32>
    %11 = vector.broadcast %10 : vector<1x17xf32> to vector<200x17xf32>
    %12 = arith.addf %9, %11 : vector<200x17xf32>
    %c0_11 = arith.constant 0 : index
    %c0_12 = arith.constant 0 : index
    %13 = vector.load %arg6[%c0_11, %c0_12] : memref<200x17xf32, #tpu.memory_space<vmem>>, vector<200x17xf32>
    tpu.vector_store %arg6[%c0_11, %c0_12], %12 {strides = array<i32>} : memref<200x17xf32, #tpu.memory_space<vmem>>, vector<200x17xf32>,
    return
  }
  func.func @transform_0(%arg0: i32) -> (i32, i32) {
    %c0_i32 = arith.constant 0 : i32
    %c0_i32_0 = arith.constant 0 : i32
    return %arg0, %c0_i32 : i32, i32
  }
  func.func @transform_1(%arg0: i32) -> (i32, i32) {
    %c0_i32 = arith.constant 0 : i32
    %c0_i32_0 = arith.constant 0 : i32
    %c0_i32_1 = arith.constant 0 : i32
    return %c0_i32, %c0_i32_0 : i32, i32
  }
  func.func @transform_2(%arg0: i32) -> (i32, i32) {
    %c0_i32 = arith.constant 0 : i32
    %c0_i32_0 = arith.constant 0 : i32
    %c0_i32_1 = arith.constant 0 : i32
    return %c0_i32, %c0_i32_0 : i32, i32
  }
  func.func @transform_3(%arg0: i32) -> (i32, i32) {
    %c0_i32 = arith.constant 0 : i32
    %c0_i32_0 = arith.constant 0 : i32
    %c0_i32_1 = arith.constant 0 : i32
    return %c0_i32, %c0_i32_0 : i32, i32
  }
  func.func @transform_4(%arg0: i32) -> (i32, i32) {
    %c0_i32 = arith.constant 0 : i32
    %c0_i32_0 = arith.constant 0 : i32
    %c0_i32_1 = arith.constant 0 : i32
    return %c0_i32, %c0_i32_0 : i32, i32
  }
  func.func @transform_5(%arg0: i32) -> (i32, i32) {
    %c0_i32 = arith.constant 0 : i32
    %c0_i32_0 = arith.constant 0 : i32
    return %arg0, %c0_i32 : i32, i32
  }
}

</mosaic_0001>

<bundles_post_ra>
// kernel: tpu_custom_call.1
= control target key start
LH: loop header
LB: loop body
LE: loop exit
PB: predicated region body
PF: predicated region fallthrough
CT: control target
= control target key end

     0   :  { %vm130_vm0 = vcmask 1041408   ;;  %v977_v0 = vmov 0.0|0.0   ;;  %vm978_vm1 = vmmov 1   ;;  %vm979_vm3 = vmmov 0   ;;  %s1428_s1 = inlined_call_operand.vmem [shape: f32[10,60], index: 1, kind: input, shape index: {}]   ;;  %s1429_s0 = inlined_call_operand.vmem [shape: f32[200,10], index: 0, kind: input, shape index: {}]   ;;  %s1430_s3 = inlined_call_operand.vmem [shape: f32[60,17], index: 3, kind: input, shape index: {}]   ;;  %s1431_s2 = inlined_call_operand.vmem [shape: f32[1,60], index: 2, kind: input, shape index: {}]   ;;  %s1432_s4 = inlined_call_operand.vmem [shape: f32[1,17], index: 4, kind: input, shape index: {}]   ;;  %s1433_s5 = inlined_call_operand.vmem [shape: f32[200,17], index: 5, kind: output, shape index: {}]  }
   0x1   :  { %948 = vmatprep.subr.bf16.mxu0 %v977_v0  ;;  %v45_v1 = vld [vmem:[%s1428_s1] sm:$0xff]  ;;  %v46_v2 = vld [vmem:[%s1428_s1 + $0x8] sm:$0x3]  ;;  %vm950_vm2 = vmpackc.low %vm130_vm0, %vm978_vm1  ;;  %965 = vmatprep.subr.bf16.mxu1 %v977_v0  ;;  %v980_v4 = vmov 0.0   ;;  %vm54_vm4 = vcmask 80896   ;;  %vm440_vm5 = vcmask 1043456  }
   0x2   :  { %v949_v3 = vpack.c.bf16 %v46_v2, %v45_v1  ;;  %782 = vmatprep.mubr.msk.f32.mxu0 %vm979_vm3, %v980_v4  ;;  %876 = vmatprep.mubr.msk.f32.mxu1 %vm979_vm3, %v980_v4  ;;  %v20_v5 = vld [vmem:[%s1429_s0] sm:$0xff]  ;;  %v21_v6 = vld [vmem:[%s1429_s0 + $0x8] sm:$0xff]  ;;  %v351_v9 = vld [vmem:[%s1430_s3 + $0x10] sm:$0xff]  ;;  %vm364_vm7 = vcmask 490496   ;;  %vm634_vm8 = vcmask 138240  }
   0x3   :  { %v349_v7 = vld [vmem:[%s1430_s3] sm:$0xff]  ;;  %v350_v8 = vld [vmem:[%s1430_s3 + $0x8] sm:$0xff]  ;;  %v352_v10 = vld [vmem:[%s1430_s3 + $0x18] sm:$0xff] }
   0x4   :  { %951 = vmatpush3.bf16.msk.msra.mxu0 %vm950_vm2, %v949_v3  ;;  %v22_v11 = vld [vmem:[%s1429_s0 + $0x10] sm:$0xff]  ;;  %v953_v12 = vpack.c.bf16 %v350_v8, %v349_v7  ;;  %v956_v13 = vpack.c.bf16 %v352_v10, %v351_v9  ;;  %v353_v14 = vld [vmem:[%s1430_s3 + $0x20] sm:$0xff]  ;;  %v354_v15 = vld [vmem:[%s1430_s3 + $0x28] sm:$0xff] }
   0x5   :  { %952 = vmatprep.subr.bf16.mxu0 %v977_v0  ;;  %v23_v16 = vld [vmem:[%s1429_s0 + $0x18] sm:$0xff]  ;;  %v959_v17 = vpack.c.bf16 %v354_v15, %v353_v14  ;;  %v24_v18 = vld [vmem:[%s1429_s0 + $0x20] sm:$0xff]  ;;  %v25_v19 = vld [vmem:[%s1429_s0 + $0x28] sm:$0xff] }
   0x6   :  { %969 = vmatpush3.bf16.msra.mxu1 %v953_v12  ;;  %v26_v20 = vld [vmem:[%s1429_s0 + $0x30] sm:$0xff]  ;;  %v27_v21 = vld [vmem:[%s1429_s0 + $0x38] sm:$0xff]  ;;  %v28_v22 = vld [vmem:[%s1429_s0 + $0x40] sm:$0xff] }
   0x7   :  { %783 = vmatmul.mubr.msk.f32.vlgmr.msra.gmra.mrb[0].mxu0 %vm54_vm4, %v20_v5  ;;  %966 = vmatprep.subr.bf16.mxu1 %v977_v0  ;;  %v29_v23 = vld [vmem:[%s1429_s0 + $0x48] sm:$0xff]  ;;  %v30_v24 = vld [vmem:[%s1429_s0 + $0x50] sm:$0xff]  ;;  %v31_v25 = vld [vmem:[%s1429_s0 + $0x58] sm:$0xff] }
   0x8   :  { %785 = vmatprep.mubr.msk.f32.mxu0 %vm979_vm3, %v980_v4  ;;  %954 = vmatpush3.bf16.msra.mxu0 %v953_v12  ;;  %v32_v26 = vld [vmem:[%s1429_s0 + $0x60] sm:$0xff]  ;;  %v33_v27 = vld [vmem:[%s1429_s0 + $0x68] sm:$0xff]  ;;  %v34_v28 = vld [vmem:[%s1429_s0 + $0x70] sm:$0xff] }
   0x9   :  { %955 = vmatprep.subr.bf16.mxu0 %v977_v0  ;;  %v35_v29 = vld [vmem:[%s1429_s0 + $0x78] sm:$0xff]  ;;  %v36_v30 = vld [vmem:[%s1429_s0 + $0x80] sm:$0xff]  ;;  %v37_v31 = vld [vmem:[%s1429_s0 + $0x88] sm:$0xff] }
   0xa   :  { %970 = vmatpush3.bf16.msra.mxu1 %v956_v13  ;;  %v38_v32 = vld [vmem:[%s1429_s0 + $0x90] sm:$0xff]  ;;  %v39_v33 = vld [vmem:[%s1429_s0 + $0x98] sm:$0xff]  ;;  %v40_v34 = vld [vmem:[%s1429_s0 + $0xa0] sm:$0xff] }
   0xb   :  { %786 = vmatmul.mubr.msk.f32.gmra.mrb[2].mxu0 %vm54_vm4, %v21_v6  ;;  %967 = vmatprep.subr.bf16.mxu1 %v977_v0  ;;  %v41_v35 = vld [vmem:[%s1429_s0 + $0xa8] sm:$0xff]  ;;  %vm963_vm6 = vmpackc.low %vm440_vm5, %vm978_vm1  ;;  %v355_v36 = vld [vmem:[%s1430_s3 + $0x30] sm:$0xff] }
   0xc   :  { %788 = vmatprep.mubr.msk.f32.mxu0 %vm979_vm3, %v980_v4  ;;  %957 = vmatpush3.bf16.msra.mxu0 %v956_v13  ;;  %v356_v37 = vld [vmem:[%s1430_s3 + $0x38] sm:$0xf]  ;;  %v42_v39 = vld [vmem:[%s1429_s0 + $0xb0] sm:$0xff]  ;;  %v44_v41 = vld [vmem:[%s1429_s0 + $0xc0] sm:$0xff] }
   0xd   :  { %958 = vmatprep.subr.bf16.mxu0 %v977_v0  ;;  %v962_v38 = vpack.c.bf16 %v356_v37, %v355_v36  ;;  %v43_v40 = vld [vmem:[%s1429_s0 + $0xb8] sm:$0xff]  ;;  %v1200_v42 = vld [vmem:[%s1431_s2] ss:$0 sm:$0xff] }
   0xe   :  { %971 = vmatpush3.bf16.msra.mxu1 %v959_v17 }
   0xf   :  { %789 = vmatmul.mubr.msk.f32.gmra.mrb[4].mxu0 %vm54_vm4, %v22_v11  ;;  %968 = vmatprep.subr.bf16.mxu1 %v977_v0 }
  0x10   :  { %791 = vmatprep.mubr.msk.f32.mxu0 %vm979_vm3, %v980_v4  ;;  %960 = vmatpush3.bf16.msra.mxu0 %v959_v17 }
  0x11   :  { %961 = vmatprep.subr.bf16.mxu0 %v977_v0 }
  0x12   :  { %972 = vmatpush3.bf16.msk.msra.mxu1 %vm963_vm6, %v962_v38 }
  0x13   :  { %792 = vmatmul.mubr.msk.f32.gmra.mrb[6].mxu0 %vm54_vm4, %v23_v16 }
  0x14   :  { %794 = vmatprep.mubr.msk.f32.mxu0 %vm979_vm3, %v980_v4  ;;  %964 = vmatpush3.bf16.msk.msra.mxu0 %vm963_vm6, %v962_v38 }
  0x17   :  { %795 = vmatmul.mubr.msk.f32.gmra.mrb[8].mxu0 %vm54_vm4, %v24_v18 }
  0x18   :  { %797 = vmatprep.mubr.msk.f32.mxu0 %vm979_vm3, %v980_v4 }
  0x1b   :  { %798 = vmatmul.mubr.msk.f32.gmra.mrb[10].mxu0 %vm54_vm4, %v25_v19 }
  0x1c   :  { %800 = vmatprep.mubr.msk.f32.mxu0 %vm979_vm3, %v980_v4 }
  0x1f   :  { %801 = vmatmul.mubr.msk.f32.gmra.mrb[12].mxu0 %vm54_vm4, %v26_v20 }
  0x20   :  { %803 = vmatprep.mubr.msk.f32.mxu0 %vm979_vm3, %v980_v4 }
  0x23   :  { %804 = vmatmul.mubr.msk.f32.gmra.mrb[14].mxu0 %vm54_vm4, %v27_v21 }
  0x24   :  { %806 = vmatprep.mubr.msk.f32.mxu0 %vm979_vm3, %v980_v4 }
  0x27   :  { %807 = vmatmul.mubr.msk.f32.gmra.mrb[16].mxu0 %vm54_vm4, %v28_v22 }
  0x28   :  { %809 = vmatprep.mubr.msk.f32.mxu0 %vm979_vm3, %v980_v4 }
  0x2b   :  { %810 = vmatmul.mubr.msk.f32.gmra.mrb[18].mxu0 %vm54_vm4, %v29_v23 }
  0x2c   :  { %812 = vmatprep.mubr.msk.f32.mxu0 %vm979_vm3, %v980_v4 }
  0x2f   :  { %813 = vmatmul.mubr.msk.f32.gmra.mrb[20].mxu0 %vm54_vm4, %v30_v24 }
  0x30   :  { %815 = vmatprep.mubr.msk.f32.mxu0 %vm979_vm3, %v980_v4 }
  0x33   :  { %816 = vmatmul.mubr.msk.f32.gmra.mrb[22].mxu0 %vm54_vm4, %v31_v25 }
  0x34   :  { %818 = vmatprep.mubr.msk.f32.mxu0 %vm979_vm3, %v980_v4 }
  0x37   :  { %819 = vmatmul.mubr.msk.f32.gmra.mrb[24].mxu0 %vm54_vm4, %v32_v26 }
  0x38   :  { %821 = vmatprep.mubr.msk.f32.mxu0 %vm979_vm3, %v980_v4 }
  0x3b   :  { %822 = vmatmul.mubr.msk.f32.gmra.mrb[26].mxu0 %vm54_vm4, %v33_v27 }
  0x3c   :  { %824 = vmatprep.mubr.msk.f32.mxu0 %vm979_vm3, %v980_v4 }
  0x3f   :  { %825 = vmatmul.mubr.msk.f32.gmra.mrb[28].mxu0 %vm54_vm4, %v34_v28 }
  0x40   :  { %827 = vmatprep.mubr.msk.f32.mxu0 %vm979_vm3, %v980_v4 }
  0x43   :  { %828 = vmatmul.mubr.msk.f32.gmra.mrb[30].mxu0 %vm54_vm4, %v35_v29 }
  0x44   :  { %830 = vmatprep.mubr.msk.f32.mxu0 %vm979_vm3, %v980_v4 }
  0x47   :  { %831 = vmatmul.mubr.msk.f32.gmra.mrb[32].mxu0 %vm54_vm4, %v36_v30 }
  0x48   :  { %833 = vmatprep.mubr.msk.f32.mxu0 %vm979_vm3, %v980_v4 }
  0x4b   :  { %834 = vmatmul.mubr.msk.f32.gmra.mrb[34].mxu0 %vm54_vm4, %v37_v31 }
  0x4c   :  { %836 = vmatprep.mubr.msk.f32.mxu0 %vm979_vm3, %v980_v4 }
  0x4f   :  { %837 = vmatmul.mubr.msk.f32.gmra.mrb[36].mxu0 %vm54_vm4, %v38_v32 }
  0x50   :  { %839 = vmatprep.mubr.msk.f32.mxu0 %vm979_vm3, %v980_v4 }
  0x53   :  { %840 = vmatmul.mubr.msk.f32.gmra.mrb[38].mxu0 %vm54_vm4, %v39_v33 }
  0x54   :  { %842 = vmatprep.mubr.msk.f32.mxu0 %vm979_vm3, %v980_v4 }
  0x57   :  { %843 = vmatmul.mubr.msk.f32.gmra.mrb[40].mxu0 %vm54_vm4, %v40_v34 }
  0x58   :  { %845 = vmatprep.mubr.msk.f32.mxu0 %vm979_vm3, %v980_v4 }
  0x5b   :  { %846 = vmatmul.mubr.msk.f32.gmra.mrb[42].mxu0 %vm54_vm4, %v41_v35 }
  0x5c   :  { %848 = vmatprep.mubr.msk.f32.mxu0 %vm979_vm3, %v980_v4 }
  0x5f   :  { %849 = vmatmul.mubr.msk.f32.gmra.mrb[44].mxu0 %vm54_vm4, %v42_v39 }
  0x60   :  { %851 = vmatprep.mubr.msk.f32.mxu0 %vm979_vm3, %v980_v4 }
  0x63   :  { %852 = vmatmul.mubr.msk.f32.gmra.mrb[46].mxu0 %vm54_vm4, %v43_v40 }
  0x64   :  { %854 = vmatprep.mubr.msk.f32.mxu0 %vm979_vm3, %v980_v4 }
  0x67   :  { %855 = vmatmul.mubr.msk.f32.gmra.mrb[48].mxu0 %vm54_vm4, %v44_v41 }
  0x68   :  { %873 = vmatprep.mubr.msk.f32.mxu0 %vm979_vm3, %v980_v4 }
  0xda   :  { %v200_v43 = vpop.f32.mrb[0].mxu0 }
  0xdb   :  { %v201_v44 = vadd.f32 %v1200_v42, %v200_v43  ;;  %v784_v45 = vpop.f32.mrb[1].mxu0 }
  0xdd   :  { %v324_v46 = vmax.f32 %v201_v44, 0.0 }
  0xde   :  { %v205_v47 = vpop.f32.mrb[2].mxu0 }
  0xdf   :  { %v206_v48 = vadd.f32 %v1200_v42, %v205_v47  ;;  %v787_v49 = vpop.f32.mrb[3].mxu0  ;;  %874 = vmatmul.mubr.msk.f32.vlgmr.msra.gmra.mrb[50].mxu0 %vm364_vm7, %v324_v46 }
  0xe1   :  { %v325_v50 = vmax.f32 %v206_v48, 0.0 }
  0xe2   :  { %v210_v51 = vpop.f32.mrb[4].mxu0 }
  0xe3   :  { %v211_v52 = vadd.f32 %v1200_v42, %v210_v51  ;;  %v790_v53 = vpop.f32.mrb[5].mxu0  ;;  %877 = vmatmul.mubr.msk.f32.vlgmr.msra.gmra.mrb[0].mxu1 %vm364_vm7, %v325_v50 }
  0xe4   :  { %879 = vmatprep.mubr.msk.f32.mxu1 %vm979_vm3, %v980_v4 }
  0xe5   :  { %v326_v54 = vmax.f32 %v211_v52, 0.0 }
  0xe6   :  { %v215_v55 = vpop.f32.mrb[6].mxu0 }
  0xe7   :  { %v216_v56 = vadd.f32 %v1200_v42, %v215_v55  ;;  %v793_v57 = vpop.f32.mrb[7].mxu0  ;;  %880 = vmatmul.mubr.msk.f32.gmra.mrb[2].mxu1 %vm364_vm7, %v326_v54 }
  0xe8   :  { %882 = vmatprep.mubr.msk.f32.mxu1 %vm979_vm3, %v980_v4 }
  0xe9   :  { %v327_v58 = vmax.f32 %v216_v56, 0.0 }
  0xea   :  { %v220_v59 = vpop.f32.mrb[8].mxu0 }
  0xeb   :  { %v221_v60 = vadd.f32 %v1200_v42, %v220_v59  ;;  %v796_v61 = vpop.f32.mrb[9].mxu0  ;;  %883 = vmatmul.mubr.msk.f32.gmra.mrb[4].mxu1 %vm364_vm7, %v327_v58 }
  0xec   :  { %885 = vmatprep.mubr.msk.f32.mxu1 %vm979_vm3, %v980_v4 }
  0xed   :  { %v328_v62 = vmax.f32 %v221_v60, 0.0 }
  0xee   :  { %v225_v63 = vpop.f32.mrb[10].mxu0 }
  0xef   :  { %v226_v0 = vadd.f32 %v1200_v42, %v225_v63  ;;  %v799_v1 = vpop.f32.mrb[11].mxu0  ;;  %886 = vmatmul.mubr.msk.f32.gmra.mrb[6].mxu1 %vm364_vm7, %v328_v62 }
  0xf0   :  { %888 = vmatprep.mubr.msk.f32.mxu1 %vm979_vm3, %v980_v4 }
  0xf1   :  { %v329_v2 = vmax.f32 %v226_v0, 0.0 }
  0xf2   :  { %v230_v3 = vpop.f32.mrb[12].mxu0 }
  0xf3   :  { %v231_v5 = vadd.f32 %v1200_v42, %v230_v3  ;;  %v802_v6 = vpop.f32.mrb[13].mxu0  ;;  %889 = vmatmul.mubr.msk.f32.gmra.mrb[8].mxu1 %vm364_vm7, %v329_v2 }
  0xf4   :  { %891 = vmatprep.mubr.msk.f32.mxu1 %vm979_vm3, %v980_v4 }
  0xf5   :  { %v330_v7 = vmax.f32 %v231_v5, 0.0 }
  0xf6   :  { %v235_v8 = vpop.f32.mrb[14].mxu0 }
  0xf7   :  { %v236_v9 = vadd.f32 %v1200_v42, %v235_v8  ;;  %v805_v10 = vpop.f32.mrb[15].mxu0  ;;  %892 = vmatmul.mubr.msk.f32.gmra.mrb[10].mxu1 %vm364_vm7, %v330_v7 }
  0xf8   :  { %894 = vmatprep.mubr.msk.f32.mxu1 %vm979_vm3, %v980_v4 }
  0xf9   :  { %v331_v11 = vmax.f32 %v236_v9, 0.0 }
  0xfa   :  { %v240_v12 = vpop.f32.mrb[16].mxu0 }
  0xfb   :  { %v241_v13 = vadd.f32 %v1200_v42, %v240_v12  ;;  %v808_v14 = vpop.f32.mrb[17].mxu0  ;;  %895 = vmatmul.mubr.msk.f32.gmra.mrb[12].mxu1 %vm364_vm7, %v331_v11 }
  0xfc   :  { %897 = vmatprep.mubr.msk.f32.mxu1 %vm979_vm3, %v980_v4 }
  0xfd   :  { %v332_v15 = vmax.f32 %v241_v13, 0.0 }
  0xfe   :  { %v245_v16 = vpop.f32.mrb[18].mxu0 }
  0xff   :  { %v246_v17 = vadd.f32 %v1200_v42, %v245_v16  ;;  %v811_v18 = vpop.f32.mrb[19].mxu0  ;;  %898 = vmatmul.mubr.msk.f32.gmra.mrb[14].mxu1 %vm364_vm7, %v332_v15 }
 0x100   :  { %900 = vmatprep.mubr.msk.f32.mxu1 %vm979_vm3, %v980_v4  ;;  %v1301_v18 = vld [vmem:[%s1432_s4] ss:$0 sm:$0xff] }
 0x101   :  { %v333_v19 = vmax.f32 %v246_v17, 0.0 }
 0x102   :  { %v250_v20 = vpop.f32.mrb[20].mxu0 }
 0x103   :  { %v251_v21 = vadd.f32 %v1200_v42, %v250_v20  ;;  %v814_v22 = vpop.f32.mrb[21].mxu0  ;;  %901 = vmatmul.mubr.msk.f32.gmra.mrb[16].mxu1 %vm364_vm7, %v333_v19 }
 0x104   :  { %903 = vmatprep.mubr.msk.f32.mxu1 %vm979_vm3, %v980_v4 }
 0x105   :  { %v334_v23 = vmax.f32 %v251_v21, 0.0 }
 0x106   :  { %v255_v24 = vpop.f32.mrb[22].mxu0 }
 0x107   :  { %v256_v25 = vadd.f32 %v1200_v42, %v255_v24  ;;  %v817_v26 = vpop.f32.mrb[23].mxu0  ;;  %904 = vmatmul.mubr.msk.f32.gmra.mrb[18].mxu1 %vm364_vm7, %v334_v23 }
 0x108   :  { %906 = vmatprep.mubr.msk.f32.mxu1 %vm979_vm3, %v980_v4 }
 0x109   :  { %v335_v27 = vmax.f32 %v256_v25, 0.0 }
 0x10a   :  { %v260_v28 = vpop.f32.mrb[24].mxu0 }
 0x10b   :  { %v261_v29 = vadd.f32 %v1200_v42, %v260_v28  ;;  %v820_v30 = vpop.f32.mrb[25].mxu0  ;;  %907 = vmatmul.mubr.msk.f32.gmra.mrb[20].mxu1 %vm364_vm7, %v335_v27 }
 0x10c   :  { %909 = vmatprep.mubr.msk.f32.mxu1 %vm979_vm3, %v980_v4 }
 0x10d   :  { %v336_v31 = vmax.f32 %v261_v29, 0.0 }
 0x10e   :  { %v265_v32 = vpop.f32.mrb[26].mxu0 }
 0x10f   :  { %v266_v33 = vadd.f32 %v1200_v42, %v265_v32  ;;  %v823_v34 = vpop.f32.mrb[27].mxu0  ;;  %910 = vmatmul.mubr.msk.f32.gmra.mrb[22].mxu1 %vm364_vm7, %v336_v31 }
 0x110   :  { %912 = vmatprep.mubr.msk.f32.mxu1 %vm979_vm3, %v980_v4 }
 0x111   :  { %v337_v35 = vmax.f32 %v266_v33, 0.0 }
 0x112   :  { %v270_v36 = vpop.f32.mrb[28].mxu0 }
 0x113   :  { %v271_v37 = vadd.f32 %v1200_v42, %v270_v36  ;;  %v826_v38 = vpop.f32.mrb[29].mxu0  ;;  %913 = vmatmul.mubr.msk.f32.gmra.mrb[24].mxu1 %vm364_vm7, %v337_v35 }
 0x114   :  { %915 = vmatprep.mubr.msk.f32.mxu1 %vm979_vm3, %v980_v4 }
 0x115   :  { %v338_v39 = vmax.f32 %v271_v37, 0.0 }
 0x116   :  { %v275_v40 = vpop.f32.mrb[30].mxu0 }
 0x117   :  { %v276_v41 = vadd.f32 %v1200_v42, %v275_v40  ;;  %v829_v43 = vpop.f32.mrb[31].mxu0  ;;  %916 = vmatmul.mubr.msk.f32.gmra.mrb[26].mxu1 %vm364_vm7, %v338_v39 }
 0x118   :  { %918 = vmatprep.mubr.msk.f32.mxu1 %vm979_vm3, %v980_v4 }
 0x119   :  { %v339_v44 = vmax.f32 %v276_v41, 0.0 }
 0x11a   :  { %v280_v45 = vpop.f32.mrb[32].mxu0 }
 0x11b   :  { %v281_v46 = vadd.f32 %v1200_v42, %v280_v45  ;;  %v832_v47 = vpop.f32.mrb[33].mxu0  ;;  %919 = vmatmul.mubr.msk.f32.gmra.mrb[28].mxu1 %vm364_vm7, %v339_v44 }
 0x11c   :  { %921 = vmatprep.mubr.msk.f32.mxu1 %vm979_vm3, %v980_v4 }
 0x11d   :  { %v340_v48 = vmax.f32 %v281_v46, 0.0 }
 0x11e   :  { %v285_v49 = vpop.f32.mrb[34].mxu0 }
 0x11f   :  { %v286_v50 = vadd.f32 %v1200_v42, %v285_v49  ;;  %v835_v51 = vpop.f32.mrb[35].mxu0  ;;  %922 = vmatmul.mubr.msk.f32.gmra.mrb[30].mxu1 %vm364_vm7, %v340_v48 }
 0x120   :  { %924 = vmatprep.mubr.msk.f32.mxu1 %vm979_vm3, %v980_v4 }
 0x121   :  { %v341_v52 = vmax.f32 %v286_v50, 0.0 }
 0x122   :  { %v290_v53 = vpop.f32.mrb[36].mxu0 }
 0x123   :  { %v291_v54 = vadd.f32 %v1200_v42, %v290_v53  ;;  %v838_v55 = vpop.f32.mrb[37].mxu0  ;;  %925 = vmatmul.mubr.msk.f32.gmra.mrb[32].mxu1 %vm364_vm7, %v341_v52 }
 0x124   :  { %927 = vmatprep.mubr.msk.f32.mxu1 %vm979_vm3, %v980_v4 }
 0x125   :  { %v342_v56 = vmax.f32 %v291_v54, 0.0 }
 0x126   :  { %v295_v57 = vpop.f32.mrb[38].mxu0 }
 0x127   :  { %v296_v58 = vadd.f32 %v1200_v42, %v295_v57  ;;  %v841_v59 = vpop.f32.mrb[39].mxu0  ;;  %928 = vmatmul.mubr.msk.f32.gmra.mrb[34].mxu1 %vm364_vm7, %v342_v56 }
 0x128   :  { %930 = vmatprep.mubr.msk.f32.mxu1 %vm979_vm3, %v980_v4 }
 0x129   :  { %v343_v60 = vmax.f32 %v296_v58, 0.0 }
 0x12a   :  { %v300_v61 = vpop.f32.mrb[40].mxu0 }
 0x12b   :  { %v301_v62 = vadd.f32 %v1200_v42, %v300_v61  ;;  %v844_v63 = vpop.f32.mrb[41].mxu0  ;;  %931 = vmatmul.mubr.msk.f32.gmra.mrb[36].mxu1 %vm364_vm7, %v343_v60 }
 0x12c   :  { %933 = vmatprep.mubr.msk.f32.mxu1 %vm979_vm3, %v980_v4 }
 0x12d   :  { %v344_v0 = vmax.f32 %v301_v62, 0.0 }
 0x12e   :  { %v305_v1 = vpop.f32.mrb[42].mxu0 }
 0x12f   :  { %v306_v2 = vadd.f32 %v1200_v42, %v305_v1  ;;  %v847_v3 = vpop.f32.mrb[43].mxu0  ;;  %934 = vmatmul.mubr.msk.f32.gmra.mrb[38].mxu1 %vm364_vm7, %v344_v0 }
 0x130   :  { %936 = vmatprep.mubr.msk.f32.mxu1 %vm979_vm3, %v980_v4 }
 0x131   :  { %v345_v5 = vmax.f32 %v306_v2, 0.0 }
 0x132   :  { %v310_v6 = vpop.f32.mrb[44].mxu0 }
 0x133   :  { %v311_v7 = vadd.f32 %v1200_v42, %v310_v6  ;;  %v850_v8 = vpop.f32.mrb[45].mxu0  ;;  %937 = vmatmul.mubr.msk.f32.gmra.mrb[40].mxu1 %vm364_vm7, %v345_v5 }
 0x134   :  { %939 = vmatprep.mubr.msk.f32.mxu1 %vm979_vm3, %v980_v4 }
 0x135   :  { %v346_v9 = vmax.f32 %v311_v7, 0.0 }
 0x136   :  { %v315_v10 = vpop.f32.mrb[46].mxu0 }
 0x137   :  { %v316_v11 = vadd.f32 %v1200_v42, %v315_v10  ;;  %v853_v12 = vpop.f32.mrb[47].mxu0  ;;  %940 = vmatmul.mubr.msk.f32.gmra.mrb[42].mxu1 %vm364_vm7, %v346_v9 }
 0x138   :  { %942 = vmatprep.mubr.msk.f32.mxu1 %vm979_vm3, %v980_v4 }
 0x139   :  { %v347_v13 = vmax.f32 %v316_v11, 0.0 }
 0x13a   :  { %v320_v14 = vpop.f32.mrb[48].mxu0 }
 0x13b   :  { %v321_v15 = vadd.f32 %v1200_v42, %v320_v14  ;;  %v856_v16 = vpop.f32.mrb[49].mxu0  ;;  %943 = vmatmul.mubr.msk.f32.gmra.mrb[44].mxu1 %vm364_vm7, %v347_v13 }
 0x13c   :  { %945 = vmatprep.mubr.msk.f32.mxu1 %vm979_vm3, %v980_v4 }
 0x13d   :  { %v348_v17 = vmax.f32 %v321_v15, 0.0 }
 0x13f   :  { %946 = vmatmul.mubr.msk.f32.gmra.mrb[46].mxu1 %vm364_vm7, %v348_v17 }
 0x1b2   :  { %v510_v19 = vpop.f32.mrb[50].mxu0 }
 0x1b3   :  { %v511_v20 = vadd.f32 %v1301_v18, %v510_v19  ;;  %v875_v21 = vpop.f32.mrb[51].mxu0 }
 0x1b5   :  { %635 = vst.msk [vmem:[%s1433_s5] sm:$0xff] %vm634_vm8, %v511_v20 }
 0x1b6   :  { %v515_v42 = vpop.f32.mrb[0].mxu1 }
 0x1b7   :  { %v516_v4 = vadd.f32 %v1301_v18, %v515_v42  ;;  %v878_v22 = vpop.f32.mrb[1].mxu1 }
 0x1b9   :  { %636 = vst.msk [vmem:[%s1433_s5 + $0x8] sm:$0xff] %vm634_vm8, %v516_v4 }
 0x1ba   :  { %v520_v23 = vpop.f32.mrb[2].mxu1 }
 0x1bb   :  { %v521_v24 = vadd.f32 %v1301_v18, %v520_v23  ;;  %v881_v25 = vpop.f32.mrb[3].mxu1 }
 0x1bd   :  { %637 = vst.msk [vmem:[%s1433_s5 + $0x10] sm:$0xff] %vm634_vm8, %v521_v24 }
 0x1be   :  { %v525_v26 = vpop.f32.mrb[4].mxu1 }
 0x1bf   :  { %v526_v27 = vadd.f32 %v1301_v18, %v525_v26  ;;  %v884_v28 = vpop.f32.mrb[5].mxu1 }
 0x1c1   :  { %638 = vst.msk [vmem:[%s1433_s5 + $0x18] sm:$0xff] %vm634_vm8, %v526_v27 }
 0x1c2   :  { %v530_v29 = vpop.f32.mrb[6].mxu1 }
 0x1c3   :  { %v531_v30 = vadd.f32 %v1301_v18, %v530_v29  ;;  %v887_v31 = vpop.f32.mrb[7].mxu1 }
 0x1c5   :  { %639 = vst.msk [vmem:[%s1433_s5 + $0x20] sm:$0xff] %vm634_vm8, %v531_v30 }
 0x1c6   :  { %v535_v32 = vpop.f32.mrb[8].mxu1 }
 0x1c7   :  { %v536_v33 = vadd.f32 %v1301_v18, %v535_v32  ;;  %v890_v34 = vpop.f32.mrb[9].mxu1 }
 0x1c9   :  { %640 = vst.msk [vmem:[%s1433_s5 + $0x28] sm:$0xff] %vm634_vm8, %v536_v33 }
 0x1ca   :  { %v540_v35 = vpop.f32.mrb[10].mxu1 }
 0x1cb   :  { %v541_v36 = vadd.f32 %v1301_v18, %v540_v35  ;;  %v893_v37 = vpop.f32.mrb[11].mxu1 }
 0x1cd   :  { %641 = vst.msk [vmem:[%s1433_s5 + $0x30] sm:$0xff] %vm634_vm8, %v541_v36 }
 0x1ce   :  { %v545_v38 = vpop.f32.mrb[12].mxu1 }
 0x1cf   :  { %v546_v39 = vadd.f32 %v1301_v18, %v545_v38  ;;  %v896_v40 = vpop.f32.mrb[13].mxu1 }
 0x1d1   :  { %642 = vst.msk [vmem:[%s1433_s5 + $0x38] sm:$0xff] %vm634_vm8, %v546_v39 }
 0x1d2   :  { %v550_v41 = vpop.f32.mrb[14].mxu1 }
 0x1d3   :  { %v551_v43 = vadd.f32 %v1301_v18, %v550_v41  ;;  %v899_v44 = vpop.f32.mrb[15].mxu1 }
 0x1d5   :  { %643 = vst.msk [vmem:[%s1433_s5 + $0x40] sm:$0xff] %vm634_vm8, %v551_v43 }
 0x1d6   :  { %v555_v45 = vpop.f32.mrb[16].mxu1 }
 0x1d7   :  { %v556_v46 = vadd.f32 %v1301_v18, %v555_v45  ;;  %v902_v47 = vpop.f32.mrb[17].mxu1 }
 0x1d9   :  { %644 = vst.msk [vmem:[%s1433_s5 + $0x48] sm:$0xff] %vm634_vm8, %v556_v46 }
 0x1da   :  { %v560_v48 = vpop.f32.mrb[18].mxu1 }
 0x1db   :  { %v561_v49 = vadd.f32 %v1301_v18, %v560_v48  ;;  %v905_v50 = vpop.f32.mrb[19].mxu1 }
 0x1dd   :  { %645 = vst.msk [vmem:[%s1433_s5 + $0x50] sm:$0xff] %vm634_vm8, %v561_v49 }
 0x1de   :  { %v565_v51 = vpop.f32.mrb[20].mxu1 }
 0x1df   :  { %v566_v52 = vadd.f32 %v1301_v18, %v565_v51  ;;  %v908_v53 = vpop.f32.mrb[21].mxu1 }
 0x1e1   :  { %646 = vst.msk [vmem:[%s1433_s5 + $0x58] sm:$0xff] %vm634_vm8, %v566_v52 }
 0x1e2   :  { %v570_v54 = vpop.f32.mrb[22].mxu1 }
 0x1e3   :  { %v571_v55 = vadd.f32 %v1301_v18, %v570_v54  ;;  %v911_v56 = vpop.f32.mrb[23].mxu1 }
 0x1e5   :  { %647 = vst.msk [vmem:[%s1433_s5 + $0x60] sm:$0xff] %vm634_vm8, %v571_v55 }
 0x1e6   :  { %v575_v57 = vpop.f32.mrb[24].mxu1 }
 0x1e7   :  { %v576_v58 = vadd.f32 %v1301_v18, %v575_v57  ;;  %v914_v59 = vpop.f32.mrb[25].mxu1 }
 0x1e9   :  { %648 = vst.msk [vmem:[%s1433_s5 + $0x68] sm:$0xff] %vm634_vm8, %v576_v58 }
 0x1ea   :  { %v580_v60 = vpop.f32.mrb[26].mxu1 }
 0x1eb   :  { %v581_v61 = vadd.f32 %v1301_v18, %v580_v60  ;;  %v917_v62 = vpop.f32.mrb[27].mxu1 }
 0x1ed   :  { %649 = vst.msk [vmem:[%s1433_s5 + $0x70] sm:$0xff] %vm634_vm8, %v581_v61 }
 0x1ee   :  { %v585_v63 = vpop.f32.mrb[28].mxu1 }
 0x1ef   :  { %v586_v0 = vadd.f32 %v1301_v18, %v585_v63  ;;  %v920_v1 = vpop.f32.mrb[29].mxu1 }
 0x1f1   :  { %650 = vst.msk [vmem:[%s1433_s5 + $0x78] sm:$0xff] %vm634_vm8, %v586_v0 }
 0x1f2   :  { %v590_v2 = vpop.f32.mrb[30].mxu1 }
 0x1f3   :  { %v591_v3 = vadd.f32 %v1301_v18, %v590_v2  ;;  %v923_v5 = vpop.f32.mrb[31].mxu1 }
 0x1f5   :  { %651 = vst.msk [vmem:[%s1433_s5 + $0x80] sm:$0xff] %vm634_vm8, %v591_v3 }
 0x1f6   :  { %v595_v6 = vpop.f32.mrb[32].mxu1 }
 0x1f7   :  { %v596_v7 = vadd.f32 %v1301_v18, %v595_v6  ;;  %v926_v8 = vpop.f32.mrb[33].mxu1 }
 0x1f9   :  { %652 = vst.msk [vmem:[%s1433_s5 + $0x88] sm:$0xff] %vm634_vm8, %v596_v7 }
 0x1fa   :  { %v600_v9 = vpop.f32.mrb[34].mxu1 }
 0x1fb   :  { %v601_v10 = vadd.f32 %v1301_v18, %v600_v9  ;;  %v929_v11 = vpop.f32.mrb[35].mxu1 }
 0x1fd   :  { %653 = vst.msk [vmem:[%s1433_s5 + $0x90] sm:$0xff] %vm634_vm8, %v601_v10 }
 0x1fe   :  { %v605_v12 = vpop.f32.mrb[36].mxu1 }
 0x1ff   :  { %v606_v13 = vadd.f32 %v1301_v18, %v605_v12  ;;  %v932_v14 = vpop.f32.mrb[37].mxu1 }
 0x201   :  { %654 = vst.msk [vmem:[%s1433_s5 + $0x98] sm:$0xff] %vm634_vm8, %v606_v13 }
 0x202   :  { %v610_v15 = vpop.f32.mrb[38].mxu1 }
 0x203   :  { %v611_v16 = vadd.f32 %v1301_v18, %v610_v15  ;;  %v935_v17 = vpop.f32.mrb[39].mxu1 }
 0x205   :  { %655 = vst.msk [vmem:[%s1433_s5 + $0xa0] sm:$0xff] %vm634_vm8, %v611_v16 }
 0x206   :  { %v615_v19 = vpop.f32.mrb[40].mxu1 }
 0x207   :  { %v616_v20 = vadd.f32 %v1301_v18, %v615_v19  ;;  %v938_v21 = vpop.f32.mrb[41].mxu1 }
 0x209   :  { %656 = vst.msk [vmem:[%s1433_s5 + $0xa8] sm:$0xff] %vm634_vm8, %v616_v20 }
 0x20a   :  { %v620_v42 = vpop.f32.mrb[42].mxu1 }
 0x20b   :  { %v621_v4 = vadd.f32 %v1301_v18, %v620_v42  ;;  %v941_v22 = vpop.f32.mrb[43].mxu1 }
 0x20d   :  { %657 = vst.msk [vmem:[%s1433_s5 + $0xb0] sm:$0xff] %vm634_vm8, %v621_v4 }
 0x20e   :  { %v625_v23 = vpop.f32.mrb[44].mxu1 }
 0x20f   :  { %v626_v24 = vadd.f32 %v1301_v18, %v625_v23  ;;  %v944_v25 = vpop.f32.mrb[45].mxu1 }
 0x211   :  { %658 = vst.msk [vmem:[%s1433_s5 + $0xb8] sm:$0xff] %vm634_vm8, %v626_v24 }
 0x212   :  { %v630_v26 = vpop.f32.mrb[46].mxu1 }
 0x213   :  { %v631_v27 = vadd.f32 %v1301_v18, %v630_v26  ;;  %v947_v28 = vpop.f32.mrb[47].mxu1 }
 0x215   :  { %659 = vst.msk [vmem:[%s1433_s5 + $0xc0] sm:$0xff] %vm634_vm8, %v631_v27 }

</bundles_post_ra>
